<compile_context>
chip_gen: v7x
topology: tpu7x:2x2x1
jax: 0.10.0
libtpu: 0.0.40
codegen_flags: <defaults>
</compile_context>

<pallas_src>
import functools

import jax
import jax.numpy as jnp
from jax.experimental import pallas as pl
from jax.experimental.pallas import tpu as pltpu


def _round_up(x, m):
    return (x + m - 1) // m * m


def _cdiv(a, b):
    return -(-a // b)


# ---------------------------------------------------------------------------
# Kernel
# ---------------------------------------------------------------------------
def _rgbnet_kernel(x_ref, wf_ref, wb_ref, out_ref, *, D, chunk, n_chunks, offs):
    """x_ref: (2, tile_p) f32.  wf_ref: f32 slab (K=2 weights + biases).
    wb_ref: bf16 weight slab.  out_ref: (6, tile_p) f32 (rows 0:3 coarse,
    rows 3:6 fine)."""
    f32, bf16 = jnp.float32, jnp.bfloat16
    D2, D3 = 2 * D, 3 * D
    o2, o3, o4, o5, o6 = offs

    def dot(w, a):
        return jnp.dot(w, a, preferred_element_type=f32)

    # Fully-unrolled static chunk loop (n_chunks <= 8): per-chunk live set is
    # small enough to stay in vregs, and all slice starts are static
    # multiples of `chunk` (>= 128), so every load/store is aligned.
    for ci in range(n_chunks):
        p0 = ci * chunk
        x = x_ref[:, p0:p0 + chunk]                       # (2, chunk) f32
        x0 = x[0:1, :]
        x1 = x[1:2, :]

        # --- p1: Conv(2->D) ReLU Conv(D->2D) ReLU Conv(2D->3D) ---
        # K=2 contractions stay on the VPU as rank-1 f32 updates.
        h1 = jnp.maximum(
            wf_ref[0:D, 0:1] * x0 + wf_ref[0:D, 1:2] * x1 + wf_ref[0:D, 4:5],
            0.0).astype(bf16)                             # (D, chunk)
        h = jnp.maximum(
            dot(wb_ref[o2:o2 + D2, 0:D], h1) + wf_ref[0:D2, 5:6],
            0.0).astype(bf16)                             # (2D, chunk)

        # w3 stacked with wf1@w3: rows [0,3D) -> s1, rows [3D,3D+3) -> fine
        # s1-contribution (bias already includes wf1@b3 + bf).
        big1 = dot(wb_ref[o3:o3 + D3 + 3, 0:D2], h) + wf_ref[0:D3 + 3, 6:7]
        fine = big1[D3:D3 + 3, :]                         # (3, chunk) f32
        r1 = jnp.maximum(big1[0:D3, :], 0.0).astype(bf16)  # relu(s1)

        # --- p2 first conv merged with the interm head (both consume r1) ---
        big2 = dot(wb_ref[o4:o4 + D2 + 3, 0:D3], r1) + wf_ref[0:D2 + 3, 7:8]
        coarse = big2[D2:D2 + 3, :]                       # (3, chunk) f32
        h2 = jnp.maximum(
            big2[0:D2, :] + wf_ref[0:D2, 2:3] * x0 + wf_ref[0:D2, 3:4] * x1,
            0.0).astype(bf16)                             # (2D, chunk)
        h2 = jnp.maximum(
            dot(wb_ref[o5:o5 + D2, 0:D2], h2) + wf_ref[0:D2, 8:9],
            0.0).astype(bf16)                             # (2D, chunk)

        # p2's last conv folded with final's s2-term: single (3, 2D) matmul.
        fine = fine + dot(wb_ref[o6:o6 + 3, 0:D2], h2) + wf_ref[0:3, 9:10]

        out_ref[0:3, p0:p0 + chunk] = coarse.astype(out_ref.dtype)
        out_ref[3:6, p0:p0 + chunk] = fine.astype(out_ref.dtype)


# ---------------------------------------------------------------------------
# Weight preparation (folds done in f32, shared by wrapper and matched ref)
# ---------------------------------------------------------------------------
def _prepare_mats(params):
    """Fold the head convs into the backbone convs (all in f32).
    Weights returned as (out_ch, in_ch) matrices, biases as (out_ch, 1)."""
    f32 = jnp.float32
    T = lambda w: jnp.asarray(w, f32).T            # (in, out) -> (out, in)
    col = lambda b: jnp.asarray(b, f32).reshape(-1, 1)

    W1, W2, W3 = T(params["w1"]), T(params["w2"]), T(params["w3"])
    W4x, W4s = T(params["w4x"]), T(params["w4s"])
    W5, W6 = T(params["w5"]), T(params["w6"])
    Wf1, Wf2, Wi = T(params["wf1"]), T(params["wf2"]), T(params["wi"])
    b1, b2, b3 = col(params["b1"]), col(params["b2"]), col(params["b3"])
    b4, b5, b6 = col(params["b4"]), col(params["b5"]), col(params["b6"])
    bf, bi = col(params["bf"]), col(params["bi"])

    return dict(
        w1=W1, b1=b1,
        w2=W2, b2=b2,
        # fine = wf1@s1 + wf2@s2 + bf ;  s1 = W3@h + b3 ;  s2 = W6@h2 + b6
        w3e=jnp.concatenate([W3, Wf1 @ W3], axis=0),
        b3e=jnp.concatenate([b3, Wf1 @ b3 + bf], axis=0),
        w4x=W4x,
        w4e=jnp.concatenate([W4s, Wi], axis=0),
        b4e=jnp.concatenate([b4, bi], axis=0),
        w5=W5, b5=b5,
        w6f=Wf2 @ W6,
        b6f=Wf2 @ b6,
    )


def _pack_slabs(mats, D):
    """Pack weights into one bf16 slab (row-stacked, each block padded to a
    multiple of 8 rows) and one small f32 slab (K=2 weights + bias columns)."""
    D2, D3 = 2 * D, 3 * D
    bf16, f32 = jnp.bfloat16, jnp.float32

    ws = [mats["w2"], mats["w3e"], mats["w4e"], mats["w5"], mats["w6f"]]
    offs, blocks, rows = [], [], 0
    for w in ws:
        offs.append(rows)
        r = _round_up(w.shape[0], 8)
        blk = jnp.zeros((r, D3), f32).at[:w.shape[0], :w.shape[1]].set(w)
        blocks.append(blk)
        rows += r
    wb = jnp.concatenate(blocks, axis=0).astype(bf16)

    nrows = _round_up(D3 + 3, 8)
    wf = jnp.zeros((nrows, 10), f32)
    wf = wf.at[0:D, 0:2].set(mats["w1"])        # cols 0:2  -> w1
    wf = wf.at[0:D2, 2:4].set(mats["w4x"])      # cols 2:4  -> w4x
    wf = wf.at[0:D, 4:5].set(mats["b1"])        # col 4     -> b1
    wf = wf.at[0:D2, 5:6].set(mats["b2"])       # col 5     -> b2
    wf = wf.at[0:D3 + 3, 6:7].set(mats["b3e"])  # col 6     -> b3 ext
    wf = wf.at[0:D2 + 3, 7:8].set(mats["b4e"])  # col 7     -> b4 ext
    wf = wf.at[0:D2, 8:9].set(mats["b5"])       # col 8     -> b5
    wf = wf.at[0:3, 9:10].set(mats["b6f"])      # col 9     -> folded b6
    return wf, wb, tuple(offs)


# ---------------------------------------------------------------------------
# Wrapper
# ---------------------------------------------------------------------------
@jax.jit
def rgbnet_pallas(x_nchw, params):
    """x_nchw: (N, 2, H, W) float32.  Returns (coarse, fine), each (N,3,H,W)."""
    N, Cin, H, W = x_nchw.shape
    if Cin != 2:
        raise ValueError("RGBNet expects 2 input channels")
    D = params["w1"].shape[1]
    HW = H * W

    # Pixels lane-dense, channels on sublanes; pure reshape of NCHW.
    x = x_nchw.reshape(N, Cin, HW).astype(jnp.float32)

    # --- tiling: minimize padding, aim for >= ~8 total grid steps ----------
    CHUNK_MAX, TILE_MAX = 256, 2048
    chunk = min(CHUNK_MAX, _round_up(HW, 128))
    n_tiles = max(_cdiv(HW, TILE_MAX),                 # respect max tile size
                  min(_cdiv(8, N),                     # megacore / pipelining
                      _cdiv(HW, chunk)))               # no pure-padding tiles
    tile_p = _round_up(_cdiv(HW, n_tiles), chunk)
    n_tiles = _cdiv(HW, tile_p)                        # shrink back after rounding
    hw_pad = n_tiles * tile_p
    n_chunks = tile_p // chunk
    if hw_pad != HW:
        x = jnp.pad(x, ((0, 0), (0, 0), (0, hw_pad - HW)))

    mats = _prepare_mats(params)
    wf, wb, offs = _pack_slabs(mats, D)

    kernel = functools.partial(_rgbnet_kernel, D=D, chunk=chunk,
                               n_chunks=n_chunks, offs=offs)

    grid = (N, n_tiles)
    x_spec = pl.BlockSpec((None, Cin, tile_p), lambda n, t: (n, 0, t))
    # Slabs: full-array blocks with constant index_map -> DMA'd once, resident.
    wf_spec = pl.BlockSpec(wf.shape, lambda n, t: (0, 0))
    wb_spec = pl.BlockSpec(wb.shape, lambda n, t: (0, 0))
    out_spec = pl.BlockSpec((None, 6, tile_p), lambda n, t: (n, 0, t))

    out = pl.pallas_call(
        kernel,
        out_shape=jax.ShapeDtypeStruct((N, 6, hw_pad), jnp.float32),
        grid_spec=pltpu.PrefetchScalarGridSpec(
            num_scalar_prefetch=0,
            grid=grid,
            in_specs=[x_spec, wf_spec, wb_spec],
            out_specs=out_spec,
        ),
        compiler_params=pltpu.CompilerParams(
            dimension_semantics=("parallel", "parallel"),
            vmem_limit_bytes=32 * 1024 * 1024,
        ),
    )(x, wf, wb)

    out = out[:, :, :HW].reshape(N, 6, H, W)
    return out[:, :3], out[:, 3:]


# ---------------------------------------------------------------------------
# References
# ---------------------------------------------------------------------------
def rgbnet_ref(x_nchw, params):
    """Pure-f32 reference implementing the module math directly."""
    N, Cin, H, W = x_nchw.shape
    x = jnp.transpose(x_nchw, (0, 2, 3, 1)).reshape(-1, Cin).astype(jnp.float32)
    relu = lambda v: jnp.maximum(v, 0.0)
    hi = jax.lax.Precision.HIGHEST
    mm = lambda a, w: jnp.dot(a, w, precision=hi, preferred_element_type=jnp.float32)

    h = relu(mm(x, params["w1"]) + params["b1"])
    h = relu(mm(h, params["w2"]) + params["b2"])
    s1 = mm(h, params["w3"]) + params["b3"]
    r1 = relu(s1)
    h2 = relu(mm(x, params["w4x"]) + mm(r1, params["w4s"]) + params["b4"])
    h2 = relu(mm(h2, params["w5"]) + params["b5"])
    s2 = mm(h2, params["w6"]) + params["b6"]
    fine = mm(s1, params["wf1"]) + mm(s2, params["wf2"]) + params["bf"]
    coarse = mm(r1, params["wi"]) + params["bi"]
    to_nchw = lambda y: jnp.transpose(y.reshape(N, H, W, 3), (0, 3, 1, 2))
    return to_nchw(coarse), to_nchw(fine)


def rgbnet_ref_matched(x_nchw, params):
    """Reference mirroring the kernel numerics exactly: folds in f32, hidden
    dots in bf16 with f32 accumulation, K=2 contributions in f32."""
    N, Cin, H, W = x_nchw.shape
    D = params["w1"].shape[1]
    D2, D3 = 2 * D, 3 * D
    m = _prepare_mats(params)
    bf16, f32 = jnp.bfloat16, jnp.float32
    x = x_nchw.reshape(N, Cin, H * W).astype(f32)
    x0, x1 = x[:, 0:1, :], x[:, 1:2, :]
    relu = lambda v: jnp.maximum(v, 0.0)

    def dot(w, a):
        return jnp.einsum("oi,nip->nop", w.astype(bf16), a,
                          preferred_element_type=f32)

    h1 = relu(m["w1"][:, 0:1] * x0 + m["w1"][:, 1:2] * x1 + m["b1"]).astype(bf16)
    h = relu(dot(m["w2"], h1) + m["b2"]).astype(bf16)
    big1 = dot(m["w3e"], h) + m["b3e"]
    fine = big1[:, D3:D3 + 3, :]
    r1 = relu(big1[:, 0:D3, :]).astype(bf16)
    big2 = dot(m["w4e"], r1) + m["b4e"]
    coarse = big2[:, D2:D2 + 3, :]
    h2 = relu(big2[:, 0:D2, :]
              + m["w4x"][:, 0:1] * x0 + m["w4x"][:, 1:2] * x1).astype(bf16)
    h2 = relu(dot(m["w5"], h2) + m["b5"]).astype(bf16)
    fine = fine + dot(m["w6f"], h2) + m["b6f"]
    to_nchw = lambda y: y.reshape(N, 3, H, W)
    return to_nchw(coarse), to_nchw(fine)


# ---------------------------------------------------------------------------
# Synthetic parameters (shapes match the PyTorch module, (in, out) layout)
# ---------------------------------------------------------------------------
def init_params(key, internal_dim):
    D = internal_dim
    shapes = {
        "w1": (2, D), "b1": (1, D),
        "w2": (D, 2 * D), "b2": (1, 2 * D),
        "w3": (2 * D, 3 * D), "b3": (1, 3 * D),
        "w4x": (2, 2 * D), "w4s": (3 * D, 2 * D), "b4": (1, 2 * D),
        "w5": (2 * D, 2 * D), "b5": (1, 2 * D),
        "w6": (2 * D, 2 * D), "b6": (1, 2 * D),
        "wf1": (3 * D, 3), "wf2": (2 * D, 3), "bf": (1, 3),
        "wi": (3 * D, 3), "bi": (1, 3),
    }
    params = {}
    keys = jax.random.split(key, len(shapes))
    for k, (name, shp) in zip(keys, sorted(shapes.items())):
        fan_in = shp[0] if len(shp) == 2 and shp[0] > 1 else max(shp)
        scale = 1.0 / jnp.sqrt(jnp.float32(fan_in))
        params[name] = scale * jax.random.normal(k, shp, dtype=jnp.float32)
    return params


if __name__ == "__main__":
    key = jax.random.PRNGKey(0)
    k_x, k_p = jax.random.split(key)

    internal_dim = 32
    N, H, W = 2, 16, 16
    x = jax.random.normal(k_x, (N, 2, H, W), dtype=jnp.float32)  # NCHW, 2 channels
    params = init_params(k_p, internal_dim)

    coarse, fine = rgbnet_pallas(x, params)
    coarse, fine = jax.block_until_ready((coarse, fine))
    assert coarse.shape == (N, 3, H, W) and fine.shape == (N, 3, H, W)

    # Like-for-like check: reference with identical fold + bf16-dot policy.
    coarse_m, fine_m = rgbnet_ref_matched(x, params)
    assert jnp.allclose(coarse, coarse_m, atol=2e-2, rtol=2e-2)
    assert jnp.allclose(fine, fine_m, atol=2e-2, rtol=2e-2)

    # Sanity check against the full-f32 module math (loose: bf16 MXU dots).
    coarse_r, fine_r = rgbnet_ref(x, params)
    assert jnp.allclose(coarse, coarse_r, atol=1e-1, rtol=1e-1)
    assert jnp.allclose(fine, fine_r, atol=1e-1, rtol=1e-1)

    print("KERNEL_OK")
</pallas_src>

<mosaic_0001>
module attributes {stable_mosaic.version = 11 : i64} {
  func.func @_rgbnet_kernel(%arg0: i32, %arg1: i32, %arg2: memref<1x2x256xf32, #tpu.memory_space<vmem>>, %arg3: memref<104x10xf32, #tpu.memory_space<vmem>>, %arg4: memref<312x96xbf16, #tpu.memory_space<vmem>>, %arg5: memref<1x6x256xf32, #tpu.memory_space<vmem>>) attributes {dimension_semantics = [#tpu.dimension_semantics<parallel>, #tpu.dimension_semantics<parallel>], iteration_bounds = array<i64: 2, 1>, scalar_prefetch = 0 : i64, scratch_operands = 0 : i64, tpu.core_type = #tpu.core_type<tc>, window_params = [{transform_indices = @transform_0, window_bounds = array<i64: 1, 2, 256>}, {pipeline_mode = #tpu.pipeline_mode<synchronous>, transform_indices = @transform_1, window_bounds = array<i64: 104, 10>}, {pipeline_mode = #tpu.pipeline_mode<synchronous>, transform_indices = @transform_2, window_bounds = array<i64: 312, 96>}, {transform_indices = @transform_3, window_bounds = array<i64: 1, 6, 256>}]} {
    %c0 = arith.constant 0 : index
    %c0_0 = arith.constant 0 : index
    %c0_1 = arith.constant 0 : index
    %0 = vector.load %arg2[%c0, %c0_0, %c0_1] : memref<1x2x256xf32, #tpu.memory_space<vmem>>, vector<1x2x256xf32>
    %1 = vector.shape_cast %0 : vector<1x2x256xf32> to vector<2x256xf32>
    %2 = vector.extract_strided_slice %1 {offsets = [0, 0], sizes = [1, 256], strides = [1, 1]} : vector<2x256xf32> to vector<1x256xf32>
    %3 = vector.extract_strided_slice %1 {offsets = [1, 0], sizes = [1, 256], strides = [1, 1]} : vector<2x256xf32> to vector<1x256xf32>
    %c0_2 = arith.constant 0 : index
    %c0_3 = arith.constant 0 : index
    %4 = vector.load %arg3[%c0_2, %c0_3] : memref<104x10xf32, #tpu.memory_space<vmem>>, vector<32x1xf32>
    %5 = vector.broadcast %4 : vector<32x1xf32> to vector<32x256xf32>
    %6 = vector.broadcast %2 : vector<1x256xf32> to vector<32x256xf32>
    %7 = arith.mulf %5, %6 : vector<32x256xf32>
    %c0_4 = arith.constant 0 : index
    %c1 = arith.constant 1 : index
    %8 = vector.load %arg3[%c0_4, %c1] : memref<104x10xf32, #tpu.memory_space<vmem>>, vector<32x1xf32>
    %9 = vector.broadcast %8 : vector<32x1xf32> to vector<32x256xf32>
    %10 = vector.broadcast %3 : vector<1x256xf32> to vector<32x256xf32>
    %11 = arith.mulf %9, %10 : vector<32x256xf32>
    %12 = arith.addf %7, %11 : vector<32x256xf32>
    %c0_5 = arith.constant 0 : index
    %c4 = arith.constant 4 : index
    %13 = vector.load %arg3[%c0_5, %c4] : memref<104x10xf32, #tpu.memory_space<vmem>>, vector<32x1xf32>
    %14 = vector.broadcast %13 : vector<32x1xf32> to vector<32x256xf32>
    %15 = arith.addf %12, %14 : vector<32x256xf32>
    %cst = arith.constant 0.000000e+00 : f32
    %16 = vector.broadcast %cst : f32 to vector<32x256xf32>
    %17 = arith.maximumf %15, %16 : vector<32x256xf32>
    %18 = arith.truncf %17 : vector<32x256xf32> to vector<32x256xbf16>
    %c0_6 = arith.constant 0 : index
    %c0_7 = arith.constant 0 : index
    %19 = vector.load %arg4[%c0_6, %c0_7] : memref<312x96xbf16, #tpu.memory_space<vmem>>, vector<64x32xbf16>
    %cst_8 = arith.constant dense<0.000000e+00> : vector<64x256xf32>
    %20 = tpu.matmul %19, %18, %cst_8 {dimension_numbers = #tpu.dot_dimension_numbers<[1], [0], [0], [1], [0, 0, 1, 1], [], []>} : vector<64x32xbf16>, vector<32x256xbf16>, vector<64x256xf32> -> vector<64x256xf32>
    %c0_9 = arith.constant 0 : index
    %c5 = arith.constant 5 : index
    %21 = vector.load %arg3[%c0_9, %c5] : memref<104x10xf32, #tpu.memory_space<vmem>>, vector<64x1xf32>
    %22 = vector.broadcast %21 : vector<64x1xf32> to vector<64x256xf32>
    %23 = arith.addf %20, %22 : vector<64x256xf32>
    %cst_10 = arith.constant 0.000000e+00 : f32
    %24 = vector.broadcast %cst_10 : f32 to vector<64x256xf32>
    %25 = arith.maximumf %23, %24 : vector<64x256xf32>
    %26 = arith.truncf %25 : vector<64x256xf32> to vector<64x256xbf16>
    %c64 = arith.constant 64 : index
    %c0_11 = arith.constant 0 : index
    %27 = vector.load %arg4[%c64, %c0_11] : memref<312x96xbf16, #tpu.memory_space<vmem>>, vector<99x64xbf16>
    %cst_12 = arith.constant dense<0.000000e+00> : vector<99x256xf32>
    %28 = tpu.matmul %27, %26, %cst_12 {dimension_numbers = #tpu.dot_dimension_numbers<[1], [0], [0], [1], [0, 0, 1, 1], [], []>} : vector<99x64xbf16>, vector<64x256xbf16>, vector<99x256xf32> -> vector<99x256xf32>
    %c0_13 = arith.constant 0 : index
    %c6 = arith.constant 6 : index
    %29 = vector.load %arg3[%c0_13, %c6] : memref<104x10xf32, #tpu.memory_space<vmem>>, vector<99x1xf32>
    %30 = vector.broadcast %29 : vector<99x1xf32> to vector<99x256xf32>
    %31 = arith.addf %28, %30 : vector<99x256xf32>
    %32 = vector.extract_strided_slice %31 {offsets = [96, 0], sizes = [3, 256], strides = [1, 1]} : vector<99x256xf32> to vector<3x256xf32>
    %33 = vector.extract_strided_slice %31 {offsets = [0, 0], sizes = [96, 256], strides = [1, 1]} : vector<99x256xf32> to vector<96x256xf32>
    %cst_14 = arith.constant 0.000000e+00 : f32
    %34 = vector.broadcast %cst_14 : f32 to vector<96x256xf32>
    %35 = arith.maximumf %33, %34 : vector<96x256xf32>
    %36 = arith.truncf %35 : vector<96x256xf32> to vector<96x256xbf16>
    %c168 = arith.constant 168 : index
    %c0_15 = arith.constant 0 : index
    %37 = vector.load %arg4[%c168, %c0_15] : memref<312x96xbf16, #tpu.memory_space<vmem>>, vector<67x96xbf16>
    %cst_16 = arith.constant dense<0.000000e+00> : vector<67x256xf32>
    %38 = tpu.matmul %37, %36, %cst_16 {dimension_numbers = #tpu.dot_dimension_numbers<[1], [0], [0], [1], [0, 0, 1, 1], [], []>} : vector<67x96xbf16>, vector<96x256xbf16>, vector<67x256xf32> -> vector<67x256xf32>
    %c0_17 = arith.constant 0 : index
    %c7 = arith.constant 7 : index
    %39 = vector.load %arg3[%c0_17, %c7] : memref<104x10xf32, #tpu.memory_space<vmem>>, vector<67x1xf32>
    %40 = vector.broadcast %39 : vector<67x1xf32> to vector<67x256xf32>
    %41 = arith.addf %38, %40 : vector<67x256xf32>
    %42 = vector.extract_strided_slice %41 {offsets = [64, 0], sizes = [3, 256], strides = [1, 1]} : vector<67x256xf32> to vector<3x256xf32>
    %43 = vector.extract_strided_slice %41 {offsets = [0, 0], sizes = [64, 256], strides = [1, 1]} : vector<67x256xf32> to vector<64x256xf32>
    %c0_18 = arith.constant 0 : index
    %c2 = arith.constant 2 : index
    %44 = vector.load %arg3[%c0_18, %c2] : memref<104x10xf32, #tpu.memory_space<vmem>>, vector<64x1xf32>
    %45 = vector.broadcast %44 : vector<64x1xf32> to vector<64x256xf32>
    %46 = vector.broadcast %2 : vector<1x256xf32> to vector<64x256xf32>
    %47 = arith.mulf %45, %46 : vector<64x256xf32>
    %48 = arith.addf %43, %47 : vector<64x256xf32>
    %c0_19 = arith.constant 0 : index
    %c3 = arith.constant 3 : index
    %49 = vector.load %arg3[%c0_19, %c3] : memref<104x10xf32, #tpu.memory_space<vmem>>, vector<64x1xf32>
    %50 = vector.broadcast %49 : vector<64x1xf32> to vector<64x256xf32>
    %51 = vector.broadcast %3 : vector<1x256xf32> to vector<64x256xf32>
    %52 = arith.mulf %50, %51 : vector<64x256xf32>
    %53 = arith.addf %48, %52 : vector<64x256xf32>
    %cst_20 = arith.constant 0.000000e+00 : f32
    %54 = vector.broadcast %cst_20 : f32 to vector<64x256xf32>
    %55 = arith.maximumf %53, %54 : vector<64x256xf32>
    %56 = arith.truncf %55 : vector<64x256xf32> to vector<64x256xbf16>
    %c240 = arith.constant 240 : index
    %c0_21 = arith.constant 0 : index
    %57 = vector.load %arg4[%c240, %c0_21] : memref<312x96xbf16, #tpu.memory_space<vmem>>, vector<64x64xbf16>
    %cst_22 = arith.constant dense<0.000000e+00> : vector<64x256xf32>
    %58 = tpu.matmul %57, %56, %cst_22 {dimension_numbers = #tpu.dot_dimension_numbers<[1], [0], [0], [1], [0, 0, 1, 1], [], []>} : vector<64x64xbf16>, vector<64x256xbf16>, vector<64x256xf32> -> vector<64x256xf32>
    %c0_23 = arith.constant 0 : index
    %c8 = arith.constant 8 : index
    %59 = vector.load %arg3[%c0_23, %c8] : memref<104x10xf32, #tpu.memory_space<vmem>>, vector<64x1xf32>
    %60 = vector.broadcast %59 : vector<64x1xf32> to vector<64x256xf32>
    %61 = arith.addf %58, %60 : vector<64x256xf32>
    %cst_24 = arith.constant 0.000000e+00 : f32
    %62 = vector.broadcast %cst_24 : f32 to vector<64x256xf32>
    %63 = arith.maximumf %61, %62 : vector<64x256xf32>
    %64 = arith.truncf %63 : vector<64x256xf32> to vector<64x256xbf16>
    %c304 = arith.constant 304 : index
    %c0_25 = arith.constant 0 : index
    %65 = vector.load %arg4[%c304, %c0_25] : memref<312x96xbf16, #tpu.memory_space<vmem>>, vector<3x64xbf16>
    %cst_26 = arith.constant dense<0.000000e+00> : vector<3x256xf32>
    %66 = tpu.matmul %65, %64, %cst_26 {dimension_numbers = #tpu.dot_dimension_numbers<[1], [0], [0], [1], [0, 0, 1, 1], [], []>} : vector<3x64xbf16>, vector<64x256xbf16>, vector<3x256xf32> -> vector<3x256xf32>
    %67 = arith.addf %32, %66 : vector<3x256xf32>
    %c0_27 = arith.constant 0 : index
    %c9 = arith.constant 9 : index
    %68 = vector.load %arg3[%c0_27, %c9] : memref<104x10xf32, #tpu.memory_space<vmem>>, vector<3x1xf32>
    %69 = vector.broadcast %68 : vector<3x1xf32> to vector<3x256xf32>
    %70 = arith.addf %67, %69 : vector<3x256xf32>
    %c0_28 = arith.constant 0 : index
    %c0_29 = arith.constant 0 : index
    %c0_30 = arith.constant 0 : index
    %71 = vector.load %arg5[%c0_28, %c0_29, %c0_30] : memref<1x6x256xf32, #tpu.memory_space<vmem>>, vector<1x3x256xf32>
    %72 = vector.shape_cast %71 : vector<1x3x256xf32> to vector<3x256xf32>
    %73 = vector.shape_cast %42 : vector<3x256xf32> to vector<1x3x256xf32>
    tpu.vector_store %arg5[%c0_28, %c0_29, %c0_30], %73 {strides = array<i32>} : memref<1x6x256xf32, #tpu.memory_space<vmem>>, vector<1x3x256xf32>,
    %c0_31 = arith.constant 0 : index
    %c3_32 = arith.constant 3 : index
    %c0_33 = arith.constant 0 : index
    %74 = vector.load %arg5[%c0_31, %c3_32, %c0_33] : memref<1x6x256xf32, #tpu.memory_space<vmem>>, vector<1x3x256xf32>
    %75 = vector.shape_cast %74 : vector<1x3x256xf32> to vector<3x256xf32>
    %76 = vector.shape_cast %70 : vector<3x256xf32> to vector<1x3x256xf32>
    tpu.vector_store %arg5[%c0_31, %c3_32, %c0_33], %76 {strides = array<i32>} : memref<1x6x256xf32, #tpu.memory_space<vmem>>, vector<1x3x256xf32>,
    return
  }
  func.func @transform_0(%arg0: i32, %arg1: i32) -> (i32, i32, i32) {
    %c0_i32 = arith.constant 0 : i32
    %c0_i32_0 = arith.constant 0 : i32
    return %arg0, %c0_i32, %arg1 : i32, i32, i32
  }
  func.func @transform_1(%arg0: i32, %arg1: i32) -> (i32, i32) {
    %c0_i32 = arith.constant 0 : i32
    %c0_i32_0 = arith.constant 0 : i32
    %c0_i32_1 = arith.constant 0 : i32
    return %c0_i32, %c0_i32_0 : i32, i32
  }
  func.func @transform_2(%arg0: i32, %arg1: i32) -> (i32, i32) {
    %c0_i32 = arith.constant 0 : i32
    %c0_i32_0 = arith.constant 0 : i32
    %c0_i32_1 = arith.constant 0 : i32
    return %c0_i32, %c0_i32_0 : i32, i32
  }
  func.func @transform_3(%arg0: i32, %arg1: i32) -> (i32, i32, i32) {
    %c0_i32 = arith.constant 0 : i32
    %c0_i32_0 = arith.constant 0 : i32
    return %arg0, %c0_i32, %arg1 : i32, i32, i32
  }
}

</mosaic_0001>

<bundles_post_ra>
// kernel: rgbnet_pallas.1
= control target key start
LH: loop header
LB: loop body
LE: loop exit
PB: predicated region body
PF: predicated region fallthrough
CT: control target
= control target key end

     0   :  { %s1666_s12 = smov 0   ;;  %s1668_s13 = smov 0   ;;  %s2034_s0 = inlined_call_operand.vmem [shape: f32[2,2,256], index: 0, kind: input, shape index: {}]   ;;  %s2035_s1 = inlined_call_operand.vmem [shape: f32[104,10], index: 1, kind: input, shape index: {}]   ;;  %s2036_s2 = inlined_call_operand.vmem [shape: bf16[312,96], index: 2, kind: input, shape index: {}]   ;;  %s2037_s3 = inlined_call_operand.vmem [shape: f32[2,6,256], index: 3, kind: output, shape index: {}]  }
   0x1   :  { %s1670_s14 = smov 0  }
   0x2 LB: > { %s25_s15 = sadd.s32 1, %s1630_s13  ;;  %p1478_p0 = scmp.ge.s32.totalorder %s1634_s14, 1  ;;  %s1634_s14 = sphi %s1670_s14, %s13_s14   ;;  %s1630_s13 = sphi %s1668_s13, %s2039_s13   ;;  %s1626_s12 = sphi %s1666_s12, %s2038_s12  }
   0x3   : > { %p27_p1 = scmp.ge.s32.totalorder %s25_s15, 2  ;;  %p158_p2 = scmp.lt.s32.totalorder %s1634_s14, 3 }
   0x5   : > { %s2041_s15 = smov (%p27_p1, %s25_s15), 0  ;;  %p159_p3 = pnand %p1478_p0, %p158_p2 }
   0x6   : > { %v1689_v0 = vld [vmem:[%s2035_s1] sm:$0xff] (!%p159_p3)  ;;  %v1636_v1 = vmov (!%p159_p3), 1   ;;  %v1637_v2 = vmov (!%p159_p3), 0   ;;  %v1697_v3 = vld [vmem:[%s2035_s1 + $0x8] sm:$0xff] (!%p159_p3)  ;;  %v1704_v4 = vld [vmem:[%s2035_s1 + $0x10] sm:$0xff] (!%p159_p3)  ;;  %v1638_v6 = vmov (!%p159_p3), 4   ;;  %v237_v12 = vlaneseq (!%p159_p3) }
   0x7   : > { %162 = sbr.rel (%p159_p3) target bundleno = 1409 (0x581), region = 32  ;;  %1563 = vset.pattern.permute.xlu1 (!%p159_p3), %v1636_v1  ;;  %1562 = vset.pattern.permute.xlu0 (!%p159_p3), %v1637_v2  ;;  %v1711_v5 = vld [vmem:[%s2035_s1 + $0x18] sm:$0xff] (!%p159_p3)  ;;  %v1639_v7 = vmov (!%p159_p3), 5   ;;  %v1729_v8 = vld [vmem:[%s2035_s1 + $0x20] sm:$0xff] (!%p159_p3)  ;;  %v1734_v9 = vld [vmem:[%s2035_s1 + $0x28] sm:$0xff] (!%p159_p3)  ;;  %p191_p4 = scmp.lt.s32.totalorder (!%p159_p3), %s1626_s12, 1 }
   0x8   : > { %264 = vperm.xlu1 (!%p159_p3), %1563, %v1689_v0   ;;  %218 = vperm.xlu0 (!%p159_p3), %1562, %v1689_v0   ;;  %v1741_v10 = vld [vmem:[%s2035_s1 + $0x30] sm:$0xff] (!%p159_p3)  ;;  %v1746_v11 = vld [vmem:[%s2035_s1 + $0x38] sm:$0xff] (!%p159_p3)  ;;  %v238_v13 = vshrl.u32 (!%p159_p3), %v237_v12, 7  ;;  %vm425_vm0 = vcmask (!%p159_p3), 261120   ;;  %vm659_vm1 = vcmask (!%p159_p3), 523264   ;;  %vm904_vm2 = vcmask (!%p159_p3), 785408  }
   0x9   : > { %470 = vmatprep.mubr.bf16.mxu0 (!%p159_p3), %v1637_v2  ;;  %713 = vmatprep.mubr.bf16.mxu1 (!%p159_p3), %v1637_v2 }
   0xa   : > { %v281_v16 = vsub.s32 (!%p159_p3), 1, %v238_v13  ;;  %v285_v17 = vsub.s32 (!%p159_p3), 3, %v238_v13  ;;  %v239_v18 = vsub.s32 (!%p159_p3), 0, %v238_v13  ;;  %v243_v19 = vsub.s32 (!%p159_p3), 2, %v238_v13 }
   0xc   : > { %268 = vperm.xlu1 (!%p159_p3), %1563, %v1697_v3   ;;  %223 = vperm.xlu0 (!%p159_p3), %1562, %v1697_v3  }
   0xe   : > { %s2043_s12 = smov (!%p191_p4, %s1626_s12), 1 }
   0xf   : > { %s1526_s5 = sshll.u32 %s2043_s12, 2  ;;  %s1527_s23 = sshll.u32 %s2043_s12, 4 }
  0x10   : > { %1564 = vset.pattern.permute.xlu1 %v1637_v2  ;;  %228 = vperm.xlu0 %1562, %v1704_v4   ;;  %s198_s8 = scalar_lea.vmem %s2034_s0, %s1526_s5  ;;  %s208_s26 = scalar_lea.vmem %s2037_s3, %s1527_s23 }
  0x11   : > { %233 = vperm.xlu1 %1564, %v1711_v5   ;;  %v211_v20 = vld [vmem:[%s198_s8] sm:$0xf] }
  0x12   : > { %v282_v23 = vrot.slane %v211_v20, %v281_v16  ;;  %v286_v24 = vrot.slane %v211_v20, %v285_v17  ;;  %v240_v25 = vrot.slane %v211_v20, %v239_v18  ;;  %v244_v26 = vrot.slane %v211_v20, %v243_v19 }
  0x14   : > { %1565 = vset.pattern.permute.xlu0 %v1636_v1  ;;  %v1758_v29 = vrot.slane %v282_v23, %v281_v16  ;;  %v1760_v30 = vrot.slane %v286_v24, %v281_v16  ;;  %v1762_v31 = vrot.slane %v240_v25, %v239_v18  ;;  %v1764_v32 = vrot.slane %v244_v26, %v239_v18 }
  0x15   : > { %1566 = vset.pattern.permute.xlu1 %v1636_v1  ;;  %272 = vperm.xlu0 %1565, %v1704_v4  }
  0x16   : > { %276 = vperm.xlu1 %1566, %v1711_v5  }
  0x19   : > { %1568 = vset.pattern.permute.xlu0 %v1638_v6 }
  0x1a   : > { %1567 = vset.pattern.permute.xlu1 %v1638_v6  ;;  %318 = vperm.xlu0 %1568, %v1697_v3  }
  0x1b   : > { %314 = vperm.xlu1 %1567, %v1689_v0  }
  0x1e   : > { %1569 = vset.pattern.permute.xlu0 %v1639_v7 }
  0x1f   : > { %322 = vperm.xlu1 %1567, %v1704_v4   ;;  %367 = vperm.xlu0 %1569, %v1689_v0  }
  0x23   : > { %326 = vperm.xlu1 %1567, %v1711_v5   ;;  %382 = vperm.xlu0 %1569, %v1711_v5  }
  0x27   : > { %1570 = vset.pattern.permute.xlu1 %v1639_v7  ;;  %392 = vperm.xlu0 %1569, %v1734_v9  }
  0x28   : > { %372 = vperm.xlu1 %1570, %v1697_v3  }
  0x2b   : > { %402 = vperm.xlu0 %1569, %v1746_v11  }
  0x2c   : > { %377 = vperm.xlu1 %1570, %v1704_v4  }
  0x30   : > { %387 = vperm.xlu1 %1570, %v1729_v8  }
  0x34   : > { %397 = vperm.xlu1 %1570, %v1741_v10  }
  0x87   : > { %v265_v14 = vpop.permute.xlu1 %264  ;;  %v219_v15 = vpop.permute.xlu0 %218 }
  0x88   : > { %v297_v38 = vmul.f32 %v1758_v29, %v265_v14  ;;  %v298_v39 = vmul.f32 %v1760_v30, %v265_v14  ;;  %v255_v40 = vmul.f32 %v1762_v31, %v219_v15  ;;  %v256_v41 = vmul.f32 %v1764_v32, %v219_v15 }
  0x8a   : > { %v305_v46 = vadd.f32 %v297_v38, %v255_v40  ;;  %v306_v47 = vadd.f32 %v298_v39, %v256_v41  ;;  %v558_v38 = vld [vmem:[%s2035_s1 + $0x50] sm:$0xff]  ;;  %v557_v39 = vld [vmem:[%s2035_s1 + $0x48] sm:$0xff]  ;;  %v559_v40 = vld [vmem:[%s2035_s1 + $0x58] sm:$0xff] }
  0x8b   : > { %v269_v21 = vpop.permute.xlu1 %268  ;;  %v224_v22 = vpop.permute.xlu0 %223 }
  0x8c   : > { %v299_v33 = vmul.f32 %v1758_v29, %v269_v21  ;;  %v300_v34 = vmul.f32 %v1760_v30, %v269_v21  ;;  %v257_v35 = vmul.f32 %v1762_v31, %v224_v22  ;;  %v258_v36 = vmul.f32 %v1764_v32, %v224_v22 }
  0x8e   : > { %v307_v43 = vadd.f32 %v299_v33, %v257_v35  ;;  %v308_v44 = vadd.f32 %v300_v34, %v258_v36  ;;  %v1593_v33 = vld [vmem:[%s2036_s2 + $0x8] sm:$0xff]   ;;  %v1594_v34 = vld [vmem:[%s2036_s2 + $0x10] sm:$0xff]   ;;  %v1595_v35 = vld [vmem:[%s2036_s2 + $0x18] sm:$0xff]   ;;  %v1640_v36 = vmov 6  }
  0x8f   : > { %v229_v27 = vpop.permute.xlu0 %228  ;;  %1571 = vset.pattern.permute.xlu1 %v1640_v36  ;;  %1572 = vset.pattern.permute.xlu0 %v1640_v36 }
  0x90   : > { %v234_v28 = vpop.permute.xlu1 %233  ;;  %v259_v55 = vmul.f32 %v1762_v31, %v229_v27  ;;  %v260_v56 = vmul.f32 %v1764_v32, %v229_v27  ;;  %563 = vperm.xlu1 %1571, %v1689_v0   ;;  %568 = vperm.xlu0 %1572, %v1697_v3  }
  0x91   : > { %v261_v63 = vmul.f32 %v1762_v31, %v234_v28  ;;  %v262_v1 = vmul.f32 %v1764_v32, %v234_v28  ;;  %v1592_v28 = vld [vmem:[%s2036_s2] sm:$0xff]  }
  0x94   : > { %v273_v37 = vpop.permute.xlu0 %272  ;;  %573 = vperm.xlu1 %1571, %v1704_v4   ;;  %583 = vperm.xlu0 %1572, %v1729_v8  }
  0x95   : > { %v277_v42 = vpop.permute.xlu1 %276  ;;  %v301_v51 = vmul.f32 %v1758_v29, %v273_v37  ;;  %v302_v52 = vmul.f32 %v1760_v30, %v273_v37  ;;  %v556_v37 = vld [vmem:[%s2035_s1 + $0x40] sm:$0xff] }
  0x96   : > { %v303_v59 = vmul.f32 %v1758_v29, %v277_v42  ;;  %v304_v60 = vmul.f32 %v1760_v30, %v277_v42 }
  0x97   : > { %v309_v7 = vadd.f32 %v301_v51, %v259_v55  ;;  %v310_v12 = vadd.f32 %v302_v52, %v260_v56 }
  0x98   : > { %v311_v17 = vadd.f32 %v303_v59, %v261_v63  ;;  %v312_v18 = vadd.f32 %v304_v60, %v262_v1  ;;  %578 = vperm.xlu1 %1571, %v1711_v5   ;;  %593 = vperm.xlu0 %1572, %v1741_v10  }
  0x99   : > { %v319_v45 = vpop.permute.xlu0 %318 }
  0x9a   : > { %v331_v48 = vadd.f32 %v319_v45, %v307_v43  ;;  %v332_v49 = vadd.f32 %v319_v45, %v308_v44  ;;  %v315_v50 = vpop.permute.xlu1 %314 }
  0x9b   : > { %v329_v53 = vadd.f32 %v315_v50, %v305_v46  ;;  %v330_v54 = vadd.f32 %v315_v50, %v306_v47 }
  0x9c   : > { %v339_v57 = vmax.f32 %v331_v48, 0.0  ;;  %v340_v58 = vmax.f32 %v332_v49, 0.0  ;;  %588 = vperm.xlu1 %1571, %v1734_v9   ;;  %603 = vperm.xlu0 %1572, %v556_v37  }
  0x9d   : > { %v337_v61 = vmax.f32 %v329_v53, 0.0  ;;  %v338_v62 = vmax.f32 %v330_v54, 0.0 }
  0x9e   : > { %v323_v6 = vpop.permute.xlu1 %322  ;;  %v368_v41 = vpop.permute.xlu0 %367 }
  0x9f   : > { %v346_v13 = vpack.c.bf16 %v340_v58, %v338_v62  ;;  %v345_v14 = vpack.c.bf16 %v339_v57, %v337_v61  ;;  %v333_v15 = vadd.f32 %v323_v6, %v309_v7  ;;  %v334_v16 = vadd.f32 %v323_v6, %v310_v12 }
  0xa0   : > { %598 = vperm.xlu1 %1571, %v1746_v11   ;;  %613 = vperm.xlu0 %1572, %v558_v38  }
  0xa1   : > { %438 = vmatprep.subr.bf16.mxu0 %v346_v13  ;;  %v341_v22 = vmax.f32 %v333_v15, 0.0  ;;  %v342_v23 = vmax.f32 %v334_v16, 0.0 }
  0xa2   : > { %v327_v19 = vpop.permute.xlu1 %326  ;;  %439 = vmatpush1.bf16.msra.mxu0 %v345_v14  ;;  %v383_v61 = vpop.permute.xlu0 %382 }
  0xa3   : > { %v335_v20 = vadd.f32 %v327_v19, %v311_v17  ;;  %v336_v21 = vadd.f32 %v327_v19, %v312_v18 }
  0xa4   : > { %608 = vperm.xlu1 %1571, %v557_v39  }
  0xa5   : > { %v343_v24 = vmax.f32 %v335_v20, 0.0  ;;  %v344_v25 = vmax.f32 %v336_v21, 0.0 }
  0xa7   : > { %v348_v26 = vpack.c.bf16 %v344_v25, %v342_v23  ;;  %v347_v27 = vpack.c.bf16 %v343_v24, %v341_v22  ;;  %v373_v43 = vpop.permute.xlu1 %372  ;;  %v393_v22 = vpop.permute.xlu0 %392 }
  0xa8   : > { %618 = vperm.xlu1 %1571, %v559_v40  }
  0xa9   : > { %440 = vmatprep.subr.bf16.mxu0 %v348_v26 }
  0xaa   : > { %441 = vmatpush1.bf16.msra.mxu0 %v347_v27 }
  0xab   : > { %v378_v55 = vpop.permute.xlu1 %377 }
  0xad   : > { %1487 = vmatmul.mubr.msk.bf16.vlgmr.msra.gmra.mrb[0].mxu0 %vm425_vm0, %v1592_v28 }
  0xae   : > { %480 = vmatprep.mubr.bf16.mxu0 %v1637_v2 }
  0xaf   : > { %v388_v17 = vpop.permute.xlu1 %387 }
  0xb3   : > { %v398_v38 = vpop.permute.xlu1 %397 }
  0xb5   : > { %1488 = vmatmul.mubr.msk.bf16.gmra.mrb[4].mxu0 %vm425_vm0, %v1593_v33 }
  0xb6   : > { %490 = vmatprep.mubr.bf16.mxu0 %v1637_v2 }
  0xbd   : > { %1489 = vmatmul.mubr.msk.bf16.gmra.mrb[8].mxu0 %vm425_vm0, %v1594_v34 }
  0xbe   : > { %500 = vmatprep.mubr.bf16.mxu0 %v1637_v2 }
  0xc5   : > { %1490 = vmatmul.mubr.msk.bf16.gmra.mrb[12].mxu0 %vm425_vm0, %v1595_v35 }
  0xc6   : > { %952 = vmatprep.mubr.bf16.mxu0 %v1637_v2 }
 0x180   : > { %v472_v42 = vpop.f32.mrb[0].mxu0 }
 0x181   : > { %v473_v44 = vadd.f32 %v472_v42, %v368_v41  ;;  %v474_v45 = vpop.f32.mrb[1].mxu0 }
 0x182   : > { %v475_v46 = vadd.f32 %v474_v45, %v368_v41  ;;  %v476_v47 = vpop.f32.mrb[2].mxu0 }
 0x183   : > { %v477_v48 = vadd.f32 %v476_v47, %v373_v43  ;;  %v478_v49 = vpop.f32.mrb[3].mxu0  ;;  %v511_v51 = vmax.f32 %v473_v44, 0.0 }
 0x184   : > { %v479_v50 = vadd.f32 %v478_v49, %v373_v43  ;;  %v512_v53 = vmax.f32 %v475_v46, 0.0  ;;  %v403_v43 = vpop.permute.xlu0 %402 }
 0x185   : > { %v513_v52 = vmax.f32 %v477_v48, 0.0 }
 0x186   : > { %v514_v54 = vmax.f32 %v479_v50, 0.0 }
 0x187   : > { %v527_v56 = vpack.c.bf16 %v513_v52, %v511_v51 }
 0x188   : > { %v482_v57 = vpop.f32.mrb[4].mxu0  ;;  %v528_v58 = vpack.c.bf16 %v514_v54, %v512_v53 }
 0x189   : > { %v483_v59 = vadd.f32 %v482_v57, %v378_v55  ;;  %v484_v60 = vpop.f32.mrb[5].mxu0  ;;  %v1598_v57 = vld [vmem:[%s2036_s2 + $0x30] sm:$0xff]  }
 0x18a   : > { %v485_v62 = vadd.f32 %v484_v60, %v378_v55  ;;  %v486_v63 = vpop.f32.mrb[6].mxu0  ;;  %681 = vmatprep.subr.bf16.mxu1 %v528_v58  ;;  %v1596_v55 = vld [vmem:[%s2036_s2 + $0x20] sm:$0xff]   ;;  %v1599_v58 = vld [vmem:[%s2036_s2 + $0x38] sm:$0xff]   ;;  %v1601_v60 = vld [vmem:[%s2036_s2 + $0x48] sm:$0xff]  }
 0x18b   : > { %v487_v1 = vadd.f32 %v486_v63, %v383_v61  ;;  %v488_v6 = vpop.f32.mrb[7].mxu0  ;;  %682 = vmatpush1.bf16.msra.mxu1 %v527_v56  ;;  %v515_v12 = vmax.f32 %v483_v59, 0.0  ;;  %v1597_v56 = vld [vmem:[%s2036_s2 + $0x28] sm:$0xff]   ;;  %v1600_v59 = vld [vmem:[%s2036_s2 + $0x40] sm:$0xff]   ;;  %v1643_v63 = vmov 3  }
 0x18c   : > { %v489_v7 = vadd.f32 %v488_v6, %v383_v61  ;;  %v516_v14 = vmax.f32 %v485_v62, 0.0  ;;  %v1641_v61 = vmov 7   ;;  %v1642_v62 = vmov 2  }
 0x18d   : > { %v517_v13 = vmax.f32 %v487_v1, 0.0  ;;  %1574 = vset.pattern.permute.xlu1 %v1641_v61  ;;  %1573 = vset.pattern.permute.xlu0 %v1641_v61  ;;  %v564_v1 = vpop.permute.xlu1 %563 }
 0x18e   : > { %v518_v15 = vmax.f32 %v489_v7, 0.0  ;;  %843 = vperm.xlu1 %1574, %v1697_v3   ;;  %838 = vperm.xlu0 %1573, %v1689_v0   ;;  %v569_v7 = vpop.permute.xlu0 %568 }
 0x18f   : > { %v529_v16 = vpack.c.bf16 %v517_v13, %v515_v12 }
 0x190   : > { %v530_v18 = vpack.c.bf16 %v518_v15, %v516_v14  ;;  %v492_v19 = vpop.f32.mrb[8].mxu0 }
 0x191   : > { %v493_v20 = vadd.f32 %v492_v19, %v388_v17  ;;  %v494_v21 = vpop.f32.mrb[9].mxu0 }
 0x192   : > { %v495_v23 = vadd.f32 %v494_v21, %v388_v17  ;;  %v496_v24 = vpop.f32.mrb[10].mxu0  ;;  %683 = vmatprep.subr.bf16.mxu1 %v530_v18  ;;  %1575 = vset.pattern.permute.xlu1 %v1642_v62  ;;  %v574_v18 = vpop.permute.xlu1 %573 }
 0x193   : > { %v497_v25 = vadd.f32 %v496_v24, %v393_v22  ;;  %v498_v26 = vpop.f32.mrb[11].mxu0  ;;  %684 = vmatpush1.bf16.msra.mxu1 %v529_v16  ;;  %v519_v28 = vmax.f32 %v493_v20, 0.0  ;;  %848 = vperm.xlu0 %1573, %v1704_v4  }
 0x194   : > { %v499_v27 = vadd.f32 %v498_v26, %v393_v22  ;;  %v520_v34 = vmax.f32 %v495_v23, 0.0  ;;  %1002 = vperm.xlu1 %1575, %v1689_v0  }
 0x195   : > { %v521_v33 = vmax.f32 %v497_v25, 0.0 }
 0x196   : > { %v522_v35 = vmax.f32 %v499_v27, 0.0 }
 0x197   : > { %v531_v37 = vpack.c.bf16 %v521_v33, %v519_v28  ;;  %858 = vperm.xlu0 %1573, %v1729_v8   ;;  %v579_v33 = vpop.permute.xlu1 %578 }
 0x198   : > { %v532_v39 = vpack.c.bf16 %v522_v35, %v520_v34  ;;  %v502_v40 = vpop.f32.mrb[12].mxu0  ;;  %1576 = vset.pattern.permute.xlu1 %v1643_v63 }
 0x199   : > { %v503_v41 = vadd.f32 %v502_v40, %v398_v38  ;;  %v504_v42 = vpop.f32.mrb[13].mxu0  ;;  %1066 = vperm.xlu1 %1576, %v1689_v0  }
 0x19a   : > { %v505_v44 = vadd.f32 %v504_v42, %v398_v38  ;;  %v506_v45 = vpop.f32.mrb[14].mxu0  ;;  %685 = vmatprep.subr.bf16.mxu1 %v532_v39 }
 0x19b   : > { %v507_v46 = vadd.f32 %v506_v45, %v403_v43  ;;  %v508_v47 = vpop.f32.mrb[15].mxu0  ;;  %686 = vmatpush1.bf16.msra.mxu1 %v531_v37  ;;  %v523_v49 = vmax.f32 %v503_v41, 0.0  ;;  %868 = vperm.xlu0 %1573, %v1741_v10   ;;  %v584_v45 = vpop.permute.xlu0 %583 }
 0x19c   : > { %v509_v48 = vadd.f32 %v508_v47, %v403_v43  ;;  %v524_v51 = vmax.f32 %v505_v44, 0.0 }
 0x19d   : > { %v525_v50 = vmax.f32 %v507_v46, 0.0  ;;  %1070 = vperm.xlu1 %1576, %v1697_v3  }
 0x19e   : > { %v526_v52 = vmax.f32 %v509_v48, 0.0 }
 0x19f   : > { %v533_v53 = vpack.c.bf16 %v525_v50, %v523_v49  ;;  %1583 = vset.pattern.permute.xlu0 %v1642_v62  ;;  %v589_v50 = vpop.permute.xlu1 %588 }
 0x1a0   : > { %v534_v54 = vpack.c.bf16 %v526_v52, %v524_v51  ;;  %1006 = vperm.xlu0 %1583, %v1697_v3  }
 0x1a1   : > { %1577 = vset.pattern.permute.xlu1 %v1641_v61 }
 0x1a2   : > { %687 = vmatprep.subr.bf16.mxu1 %v534_v54  ;;  %853 = vperm.xlu1 %1577, %v1711_v5  }
 0x1a3   : > { %688 = vmatpush1.bf16.msra.mxu1 %v533_v53 }
 0x1a4   : > { %1014 = vperm.xlu0 %1583, %v1711_v5  }
 0x1a6   : > { %1498 = vmatmul.mubr.msk.bf16.vlgmr.msra.gmra.mrb[0].mxu1 %vm659_vm1, %v1596_v55  ;;  %1578 = vset.pattern.permute.xlu1 %v1642_v62 }
 0x1a7   : > { %723 = vmatprep.mubr.bf16.mxu1 %v1637_v2  ;;  %1010 = vperm.xlu1 %1578, %v1704_v4  }
 0x1a8   : > { %1022 = vperm.xlu0 %1583, %v1734_v9  }
 0x1ab   : > { %1579 = vset.pattern.permute.xlu1 %v1643_v63 }
 0x1ac   : > { %1074 = vperm.xlu1 %1579, %v1704_v4   ;;  %1030 = vperm.xlu0 %1583, %v1746_v11  }
 0x1ae   : > { %1499 = vmatmul.mubr.msk.bf16.gmra.mrb[4].mxu1 %vm659_vm1, %v1597_v56 }
 0x1af   : > { %733 = vmatprep.mubr.bf16.mxu1 %v1637_v2 }
 0x1b0   : > { %1078 = vperm.xlu1 %1579, %v1711_v5  }
 0x1b4   : > { %1580 = vset.pattern.permute.xlu1 %v1641_v61 }
 0x1b5   : > { %863 = vperm.xlu1 %1580, %v1734_v9  }
 0x1b6   : > { %1500 = vmatmul.mubr.msk.bf16.gmra.mrb[8].mxu1 %vm659_vm1, %v1598_v57 }
 0x1b7   : > { %743 = vmatprep.mubr.bf16.mxu1 %v1637_v2 }
 0x1b9   : > { %1581 = vset.pattern.permute.xlu1 %v1642_v62 }
 0x1ba   : > { %1018 = vperm.xlu1 %1581, %v1729_v8  }
 0x1be   : > { %1501 = vmatmul.mubr.msk.bf16.gmra.mrb[12].mxu1 %vm659_vm1, %v1599_v58  ;;  %1582 = vset.pattern.permute.xlu1 %v1643_v63 }
 0x1bf   : > { %753 = vmatprep.mubr.bf16.mxu1 %v1637_v2  ;;  %1082 = vperm.xlu1 %1582, %v1729_v8  }
 0x1c3   : > { %1086 = vperm.xlu1 %1582, %v1734_v9  }
 0x1c6   : > { %1502 = vmatmul.mubr.msk.bf16.gmra.mrb[16].mxu1 %vm659_vm1, %v1600_v59 }
 0x1c7   : > { %763 = vmatprep.mubr.bf16.mxu1 %v1637_v2  ;;  %1584 = vset.pattern.permute.xlu1 %v1641_v61 }
 0x1c8   : > { %873 = vperm.xlu1 %1584, %v1746_v11  }
 0x1cc   : > { %1585 = vset.pattern.permute.xlu1 %v1642_v62  ;;  %v594_v62 = vpop.permute.xlu0 %593 }
 0x1cd   : > { %1026 = vperm.xlu1 %1585, %v1741_v10  }
 0x1ce   : > { %1503 = vmatmul.mubr.msk.bf16.gmra.mrb[20].mxu1 %vm659_vm1, %v1601_v60 }
 0x1cf   : > { %773 = vmatprep.mubr.bf16.mxu1 %v1637_v2 }
 0x1d1   : > { %1586 = vset.pattern.permute.xlu1 %v1643_v63 }
 0x1d2   : > { %1090 = vperm.xlu1 %1586, %v1741_v10  }
 0x1d6   : > { %1094 = vperm.xlu1 %1586, %v1746_v11  }
 0x279   : > { %v715_v6 = vpop.f32.mrb[0].mxu1 }
 0x27a   : > { %v716_v12 = vadd.f32 %v715_v6, %v564_v1  ;;  %v717_v13 = vpop.f32.mrb[1].mxu1 }
 0x27b   : > { %v718_v14 = vadd.f32 %v717_v13, %v564_v1  ;;  %v719_v15 = vpop.f32.mrb[2].mxu1  ;;  %v599_v13 = vpop.permute.xlu1 %598 }
 0x27c   : > { %v720_v16 = vadd.f32 %v719_v15, %v569_v7  ;;  %v721_v17 = vpop.f32.mrb[3].mxu1  ;;  %v782_v20 = vmax.f32 %v716_v12, 0.0 }
 0x27d   : > { %v722_v19 = vadd.f32 %v721_v17, %v569_v7  ;;  %v783_v22 = vmax.f32 %v718_v14, 0.0 }
 0x27e   : > { %v784_v21 = vmax.f32 %v720_v16, 0.0 }
 0x27f   : > { %v785_v23 = vmax.f32 %v722_v19, 0.0 }
 0x280   : > { %v806_v24 = vpack.c.bf16 %v784_v21, %v782_v20 }
 0x281   : > { %v807_v25 = vpack.c.bf16 %v785_v23, %v783_v22  ;;  %v725_v26 = vpop.f32.mrb[4].mxu1  ;;  %v604_v23 = vpop.permute.xlu0 %603 }
 0x282   : > { %v726_v27 = vadd.f32 %v725_v26, %v574_v18  ;;  %v727_v28 = vpop.f32.mrb[5].mxu1 }
 0x283   : > { %v728_v34 = vadd.f32 %v727_v28, %v574_v18  ;;  %v729_v35 = vpop.f32.mrb[6].mxu1  ;;  %920 = vmatprep.subr.bf16.mxu0 %v807_v25  ;;  %v609_v28 = vpop.permute.xlu1 %608 }
 0x284   : > { %v730_v37 = vadd.f32 %v729_v35, %v579_v33  ;;  %v731_v38 = vpop.f32.mrb[7].mxu1  ;;  %921 = vmatpush1.bf16.msra.mxu0 %v806_v24  ;;  %v786_v40 = vmax.f32 %v726_v27, 0.0 }
 0x285   : > { %v732_v39 = vadd.f32 %v731_v38, %v579_v33  ;;  %v787_v42 = vmax.f32 %v728_v34, 0.0 }
 0x286   : > { %v788_v41 = vmax.f32 %v730_v37, 0.0 }
 0x287   : > { %v789_v43 = vmax.f32 %v732_v39, 0.0 }
 0x288   : > { %v808_v44 = vpack.c.bf16 %v788_v41, %v786_v40 }
 0x289   : > { %v809_v46 = vpack.c.bf16 %v789_v43, %v787_v42  ;;  %v735_v47 = vpop.f32.mrb[8].mxu1 }
 0x28a   : > { %v736_v48 = vadd.f32 %v735_v47, %v584_v45  ;;  %v737_v49 = vpop.f32.mrb[9].mxu1 }
 0x28b   : > { %v738_v51 = vadd.f32 %v737_v49, %v584_v45  ;;  %v739_v52 = vpop.f32.mrb[10].mxu1  ;;  %922 = vmatprep.subr.bf16.mxu0 %v809_v46  ;;  %v619_v49 = vpop.permute.xlu1 %618 }
 0x28c   : > { %v740_v53 = vadd.f32 %v739_v52, %v589_v50  ;;  %v741_v54 = vpop.f32.mrb[11].mxu1  ;;  %923 = vmatpush1.bf16.msra.mxu0 %v808_v44  ;;  %v790_v56 = vmax.f32 %v736_v48, 0.0  ;;  %v614_v44 = vpop.permute.xlu0 %613 }
 0x28d   : > { %v742_v55 = vadd.f32 %v741_v54, %v589_v50  ;;  %v791_v58 = vmax.f32 %v738_v51, 0.0 }
 0x28e   : > { %v792_v57 = vmax.f32 %v740_v53, 0.0 }
 0x28f   : > { %v793_v59 = vmax.f32 %v742_v55, 0.0 }
 0x290   : > { %v810_v60 = vpack.c.bf16 %v792_v57, %v790_v56 }
 0x291   : > { %v811_v1 = vpack.c.bf16 %v793_v59, %v791_v58  ;;  %v745_v6 = vpop.f32.mrb[12].mxu1 }
 0x292   : > { %v746_v7 = vadd.f32 %v745_v6, %v594_v62  ;;  %v747_v12 = vpop.f32.mrb[13].mxu1  ;;  %v1604_v6 = vld [vmem:[%s2036_s2 + $0x64] sm:$0xff]  }
 0x293   : > { %v748_v63 = vadd.f32 %v747_v12, %v594_v62  ;;  %v749_v14 = vpop.f32.mrb[14].mxu1  ;;  %924 = vmatprep.subr.bf16.mxu0 %v811_v1  ;;  %v1602_v62 = vld [vmem:[%s2036_s2 + $0x54] sm:$0xff]   ;;  %v1603_v1 = vld [vmem:[%s2036_s2 + $0x5c] sm:$0xff]   ;;  %v1606_v12 = vld [vmem:[%s2036_s2 + $0x50] ss:$0 sps:$4 sm:$0x33]  }
 0x294   : > { %v750_v15 = vadd.f32 %v749_v14, %v599_v13  ;;  %v751_v16 = vpop.f32.mrb[15].mxu1  ;;  %925 = vmatpush1.bf16.msra.mxu0 %v810_v60  ;;  %v794_v18 = vmax.f32 %v746_v7, 0.0  ;;  %v1605_v7 = vld [vmem:[%s2036_s2 + $0x6c] sm:$0xff]   ;;  %1504 = vmatmul.mubr.msk.bf16.gmra.mrb[24].mxu1 %vm659_vm1, %v1606_v12 }
 0x295   : > { %v752_v17 = vadd.f32 %v751_v16, %v599_v13  ;;  %v795_v20 = vmax.f32 %v748_v63, 0.0  ;;  %1257 = vmatprep.mubr.bf16.mxu1 %v1637_v2  ;;  %v1644_v13 = vmov 8   ;;  %v844_v63 = vpop.permute.xlu1 %843 }
 0x296   : > { %v796_v19 = vmax.f32 %v750_v15, 0.0  ;;  %1588 = vset.pattern.permute.xlu1 %v1644_v13  ;;  %1587 = vset.pattern.permute.xlu0 %v1644_v13 }
 0x297   : > { %v797_v21 = vmax.f32 %v752_v17, 0.0  ;;  %1166 = vperm.xlu1 %1588, %v1697_v3   ;;  %1162 = vperm.xlu0 %1587, %v1689_v0   ;;  %v560_v3 = vld [vmem:[%s2035_s1 + $0x60] sm:$0x7] }
 0x298   : > { %v812_v22 = vpack.c.bf16 %v796_v19, %v794_v18 }
 0x299   : > { %v813_v24 = vpack.c.bf16 %v797_v21, %v795_v20  ;;  %v755_v25 = vpop.f32.mrb[16].mxu1  ;;  %v1003_v14 = vpop.permute.xlu1 %1002 }
 0x29a   : > { %v756_v26 = vadd.f32 %v755_v25, %v604_v23  ;;  %v757_v27 = vpop.f32.mrb[17].mxu1  ;;  %v1034_v25 = vmul.f32 %v1003_v14, %v1764_v32 }
 0x29b   : > { %v758_v33 = vadd.f32 %v757_v27, %v604_v23  ;;  %v759_v34 = vpop.f32.mrb[18].mxu1  ;;  %926 = vmatprep.subr.bf16.mxu0 %v813_v24  ;;  %1170 = vperm.xlu1 %1588, %v1704_v4  }
 0x29c   : > { %v760_v35 = vadd.f32 %v759_v34, %v609_v28  ;;  %v761_v37 = vpop.f32.mrb[19].mxu1  ;;  %927 = vmatpush1.bf16.msra.mxu0 %v812_v22  ;;  %v798_v39 = vmax.f32 %v756_v26, 0.0  ;;  %1174 = vperm.xlu0 %1587, %v1711_v5  }
 0x29d   : > { %v762_v38 = vadd.f32 %v761_v37, %v609_v28  ;;  %v799_v41 = vmax.f32 %v758_v33, 0.0  ;;  %v1067_v15 = vpop.permute.xlu1 %1066 }
 0x29e   : > { %v800_v40 = vmax.f32 %v760_v35, 0.0  ;;  %v1097_v33 = vmul.f32 %v1067_v15, %v1758_v29 }
 0x29f   : > { %v801_v42 = vmax.f32 %v762_v38, 0.0  ;;  %1178 = vperm.xlu1 %1588, %v1729_v8   ;;  %v839_v8 = vpop.permute.xlu0 %838  ;;  %v1098_v38 = vmul.f32 %v1067_v15, %v1760_v30 }
 0x2a0   : > { %v814_v43 = vpack.c.bf16 %v800_v40, %v798_v39  ;;  %1182 = vperm.xlu0 %1587, %v1734_v9  }
 0x2a1   : > { %v815_v45 = vpack.c.bf16 %v801_v42, %v799_v41  ;;  %v765_v46 = vpop.f32.mrb[20].mxu1  ;;  %v1071_v0 = vpop.permute.xlu1 %1070 }
 0x2a2   : > { %v766_v47 = vadd.f32 %v765_v46, %v614_v44  ;;  %v767_v48 = vpop.f32.mrb[21].mxu1  ;;  %v1099_v42 = vmul.f32 %v1071_v0, %v1758_v29 }
 0x2a3   : > { %v768_v50 = vadd.f32 %v767_v48, %v614_v44  ;;  %v769_v51 = vpop.f32.mrb[22].mxu1  ;;  %928 = vmatprep.subr.bf16.mxu0 %v815_v45  ;;  %1186 = vperm.xlu1 %1588, %v1741_v10   ;;  %v849_v9 = vpop.permute.xlu0 %848  ;;  %v1100_v45 = vmul.f32 %v1071_v0, %v1760_v30 }
 0x2a4   : > { %v770_v52 = vadd.f32 %v769_v51, %v619_v49  ;;  %v771_v53 = vpop.f32.mrb[23].mxu1  ;;  %929 = vmatpush1.bf16.msra.mxu0 %v814_v43  ;;  %v802_v55 = vmax.f32 %v766_v47, 0.0  ;;  %1190 = vperm.xlu0 %1587, %v1746_v11  }
 0x2a5   : > { %v772_v54 = vadd.f32 %v771_v53, %v619_v49  ;;  %v803_v57 = vmax.f32 %v768_v50, 0.0  ;;  %v854_v4 = vpop.permute.xlu1 %853 }
 0x2a6   : > { %v804_v56 = vmax.f32 %v770_v52, 0.0 }
 0x2a7   : > { %v805_v58 = vmax.f32 %v772_v54, 0.0  ;;  %1589 = vset.pattern.permute.xlu1 %v1640_v36  ;;  %v1921_v10 = vpop.permute.xlu0 %858 }
 0x2a8   : > { %v816_v59 = vpack.c.bf16 %v804_v56, %v802_v55  ;;  %623 = vperm.xlu1 %1589, %v560_v3  }
 0x2a9   : > { %v817_v60 = vpack.c.bf16 %v805_v58, %v803_v57  ;;  %v1011_v5 = vpop.permute.xlu1 %1010 }
 0x2aa   : > { %v1037_v55 = vmul.f32 %v1011_v5, %v1762_v31 }
 0x2ab   : > { %930 = vmatprep.subr.bf16.mxu0 %v817_v60  ;;  %v1925_v18 = vpop.permute.xlu0 %868  ;;  %v1038_v60 = vmul.f32 %v1011_v5, %v1764_v32 }
 0x2ac   : > { %931 = vmatpush1.bf16.msra.mxu0 %v816_v59  ;;  %1591 = vset.pattern.permute.xlu1 %v1641_v61  ;;  %v1033_v61 = vmul.f32 %v1003_v14, %v1762_v31 }
 0x2ad   : > { %v1075_v16 = vpop.permute.xlu1 %1074 }
 0x2ae   : > { %v1101_v12 = vmul.f32 %v1075_v16, %v1758_v29  ;;  %v1102_v3 = vmul.f32 %v1075_v16, %v1760_v30 }
 0x2af   : > { %1510 = vmatmul.mubr.msk.bf16.vlgmr.msra.gmra.mrb[16].mxu0 %vm904_vm2, %v1602_v62  ;;  %v1007_v20 = vpop.permute.xlu0 %1006 }
 0x2b0   : > { %962 = vmatprep.mubr.bf16.mxu0 %v1637_v2  ;;  %v1035_v22 = vmul.f32 %v1007_v20, %v1762_v31  ;;  %v1036_v26 = vmul.f32 %v1007_v20, %v1764_v32 }
 0x2b1   : > { %v1079_v17 = vpop.permute.xlu1 %1078 }
 0x2b2   : > { %v1104_v5 = vmul.f32 %v1079_v17, %v1760_v30 }
 0x2b3   : > { %v1015_v48 = vpop.permute.xlu0 %1014 }
 0x2b4   : > { %v1039_v50 = vmul.f32 %v1015_v48, %v1762_v31  ;;  %v1040_v51 = vmul.f32 %v1015_v48, %v1764_v32 }
 0x2b5   : > { %v1923_v11 = vpop.permute.xlu1 %863 }
 0x2b7   : > { %1511 = vmatmul.mubr.msk.bf16.gmra.mrb[20].mxu0 %vm904_vm2, %v1603_v1 }
 0x2b8   : > { %972 = vmatprep.mubr.bf16.mxu0 %v1637_v2 }
 0x2b9   : > { %v1927_v19 = vpop.permute.xlu1 %1018 }
 0x2bd   : > { %v1929_v36 = vpop.permute.xlu1 %1082 }
 0x2bf   : > { %1512 = vmatmul.mubr.msk.bf16.gmra.mrb[24].mxu0 %vm904_vm2, %v1604_v6 }
 0x2c0   : > { %982 = vmatprep.mubr.bf16.mxu0 %v1637_v2 }
 0x2c1   : > { %v1937_v41 = vpop.permute.xlu1 %1086 }
 0x2c5   : > { %v1943_v54 = vpop.permute.xlu1 %873 }
 0x2c7   : > { %1513 = vmatmul.mubr.msk.bf16.gmra.mrb[28].mxu0 %vm904_vm2, %v1605_v7 }
 0x2c8   : > { %992 = vmatprep.mubr.bf16.mxu0 %v1637_v2 }
 0x382   : > { %v954_v21 = vpop.f32.mrb[16].mxu0 }
 0x383   : > { %v955_v23 = vadd.f32 %v954_v21, %v839_v8  ;;  %v956_v24 = vpop.f32.mrb[17].mxu0  ;;  %v1103_v21 = vmul.f32 %v1079_v17, %v1758_v29 }
 0x384   : > { %v957_v27 = vadd.f32 %v956_v24, %v839_v8  ;;  %v958_v28 = vpop.f32.mrb[18].mxu0  ;;  %v1027_v24 = vpop.permute.xlu1 %1026 }
 0x385   : > { %v1049_v34 = vadd.f32 %v1033_v61, %v955_v23  ;;  %v959_v35 = vadd.f32 %v958_v28, %v844_v63  ;;  %v960_v37 = vpop.f32.mrb[19].mxu0 }
 0x386   : > { %v1050_v39 = vadd.f32 %v1034_v25, %v957_v27  ;;  %v961_v40 = vadd.f32 %v960_v37, %v844_v63  ;;  %v1023_v25 = vpop.permute.xlu0 %1022 }
 0x387   : > { %v1113_v43 = vadd.f32 %v1097_v33, %v1049_v34  ;;  %v1051_v44 = vadd.f32 %v1035_v22, %v959_v35  ;;  %v1043_v27 = vmul.f32 %v1023_v25, %v1762_v31  ;;  %v1044_v16 = vmul.f32 %v1023_v25, %v1764_v32 }
 0x388   : > { %v1114_v46 = vadd.f32 %v1098_v38, %v1050_v39  ;;  %v1052_v47 = vadd.f32 %v1036_v26, %v961_v40  ;;  %v1041_v33 = vmul.f32 %v1927_v19, %v1762_v31  ;;  %v1042_v38 = vmul.f32 %v1927_v19, %v1764_v32 }
 0x389   : > { %v1115_v49 = vadd.f32 %v1099_v42, %v1051_v44  ;;  %v1129_v56 = vmax.f32 %v1113_v43, 0.0  ;;  %v1105_v44 = vmul.f32 %v1929_v36, %v1758_v29 }
 0x38a   : > { %v1116_v52 = vadd.f32 %v1100_v45, %v1052_v47  ;;  %v964_v53 = vpop.f32.mrb[20].mxu0  ;;  %v1130_v62 = vmax.f32 %v1114_v46, 0.0 }
 0x38b   : > { %v1131_v57 = vmax.f32 %v1115_v49, 0.0  ;;  %v965_v58 = vadd.f32 %v964_v53, %v849_v9  ;;  %v966_v59 = vpop.f32.mrb[21].mxu0  ;;  %v1106_v49 = vmul.f32 %v1929_v36, %v1760_v30  ;;  %v1031_v53 = vpop.permute.xlu0 %1030 }
 0x38c   : > { %v1132_v1 = vmax.f32 %v1116_v52, 0.0  ;;  %v967_v6 = vadd.f32 %v966_v59, %v849_v9  ;;  %v968_v7 = vpop.f32.mrb[22].mxu0  ;;  %v1091_v52 = vpop.permute.xlu1 %1090  ;;  %v1047_v36 = vmul.f32 %v1031_v53, %v1762_v31 }
 0x38d   : > { %v1145_v13 = vpack.c.bf16 %v1131_v57, %v1129_v56  ;;  %v1053_v63 = vadd.f32 %v1037_v55, %v965_v58  ;;  %v969_v14 = vadd.f32 %v968_v7, %v854_v4  ;;  %v970_v15 = vpop.f32.mrb[23].mxu0  ;;  %v1108_v57 = vmul.f32 %v1937_v41, %v1760_v30 }
 0x38e   : > { %v1054_v0 = vadd.f32 %v1038_v60, %v967_v6  ;;  %v971_v8 = vadd.f32 %v970_v15, %v854_v4  ;;  %v1146_v20 = vpack.c.bf16 %v1132_v1, %v1130_v62  ;;  %v1046_v15 = vmul.f32 %v1027_v24, %v1764_v32 }
 0x38f   : > { %v1117_v61 = vadd.f32 %v1101_v12, %v1053_v63  ;;  %v1055_v22 = vadd.f32 %v1039_v50, %v969_v14  ;;  %v1109_v12 = vmul.f32 %v1091_v52, %v1758_v29 }
 0x390   : > { %v1118_v23 = vadd.f32 %v1102_v3, %v1054_v0  ;;  %v1056_v9 = vadd.f32 %v1040_v51, %v971_v8  ;;  %1225 = vmatprep.subr.bf16.mxu1 %v1146_v20  ;;  %v1095_v8 = vpop.permute.xlu1 %1094  ;;  %v1048_v20 = vmul.f32 %v1031_v53, %v1764_v32 }
 0x391   : > { %v1119_v26 = vadd.f32 %v1103_v21, %v1055_v22  ;;  %1226 = vmatpush1.bf16.msra.mxu1 %v1145_v13  ;;  %v1133_v34 = vmax.f32 %v1117_v61, 0.0 }
 0x392   : > { %v1120_v28 = vadd.f32 %v1104_v5, %v1056_v9  ;;  %v974_v4 = vpop.f32.mrb[24].mxu0  ;;  %v1134_v39 = vmax.f32 %v1118_v23, 0.0  ;;  %v1110_v5 = vmul.f32 %v1091_v52, %v1760_v30 }
 0x393   : > { %v1135_v35 = vmax.f32 %v1119_v26, 0.0  ;;  %v975_v17 = vadd.f32 %v974_v4, %v1921_v10  ;;  %v976_v37 = vpop.f32.mrb[25].mxu0 }
 0x394   : > { %v1136_v40 = vmax.f32 %v1120_v28, 0.0  ;;  %v977_v42 = vadd.f32 %v976_v37, %v1921_v10  ;;  %v978_v43 = vpop.f32.mrb[26].mxu0  ;;  %v1107_v10 = vmul.f32 %v1937_v41, %v1758_v29  ;;  %v1112_v28 = vmul.f32 %v1095_v8, %v1760_v30  ;;  %v1609_v30 = vld [vmem:[%s2036_s2 + $0x88] sm:$0xff]   ;;  %v1167_v52 = vpop.permute.xlu1 %1166 }
 0x395   : > { %v1147_v45 = vpack.c.bf16 %v1135_v35, %v1133_v34  ;;  %v1057_v46 = vadd.f32 %v1041_v33, %v975_v17  ;;  %v979_v47 = vadd.f32 %v978_v43, %v1923_v11  ;;  %v980_v48 = vpop.f32.mrb[27].mxu0 }
 0x396   : > { %v1058_v50 = vadd.f32 %v1042_v38, %v977_v42  ;;  %v981_v51 = vadd.f32 %v980_v48, %v1923_v11  ;;  %v1148_v19 = vpack.c.bf16 %v1136_v40, %v1134_v39  ;;  %v1045_v11 = vmul.f32 %v1027_v24, %v1762_v31  ;;  %v1610_v39 = vld [vmem:[%s2036_s2 + $0x90] sm:$0xff]   ;;  %v2000_v40 = vpop.f32.mrb[24].mxu1 }
 0x397   : > { %v1121_v55 = vadd.f32 %v1105_v44, %v1057_v46  ;;  %v1059_v56 = vadd.f32 %v1043_v27, %v979_v47  ;;  %v1111_v24 = vmul.f32 %v1095_v8, %v1758_v29  ;;  %v1608_v29 = vld [vmem:[%s2036_s2 + $0x80] sm:$0xff]   ;;  %v2002_v42 = vpop.f32.mrb[25].mxu1  ;;  %v1645_v48 = vmov 9  }
 0x398   : > { %v1122_v58 = vadd.f32 %v1106_v49, %v1058_v50  ;;  %v1060_v59 = vadd.f32 %v1044_v16, %v981_v51  ;;  %1227 = vmatprep.subr.bf16.mxu1 %v1148_v19  ;;  %v779_v43 = vpop.f32.mrb[26].mxu1  ;;  %v1369_v46 = vld [vmem:[%s2035_s1] sm:$0x7]  ;;  %1590 = vset.pattern.permute.xlu0 %v1645_v48  ;;  %v1163_v49 = vpop.permute.xlu0 %1162 }
 0x399   : > { %v1123_v60 = vadd.f32 %v1107_v10, %v1059_v56  ;;  %1228 = vmatpush1.bf16.msra.mxu1 %v1147_v45  ;;  %v1137_v6 = vmax.f32 %v1121_v55, 0.0  ;;  %v780_v44 = vpop.f32.mrb[27].mxu1  ;;  %v1611_v45 = vld [vmem:[%s2036_s2 + $0x74] ss:$0 sps:$4 sm:$0x33]   ;;  %1372 = vperm.xlu0 %1590, %v1369_v46  }
 0x39a   : > { %v1124_v62 = vadd.f32 %v1108_v57, %v1060_v59  ;;  %v984_v1 = vpop.f32.mrb[28].mxu0  ;;  %v1138_v14 = vmax.f32 %v1122_v58, 0.0  ;;  %1514 = vmatmul.mubr.msk.bf16.gmra.mrb[32].mxu0 %vm904_vm2, %v1611_v45  ;;  %v835_v47 = vld [vmem:[%s2035_s1 + $0x40] sm:$0x7] }
 0x39b   : > { %v1139_v7 = vmax.f32 %v1123_v60, 0.0  ;;  %v985_v13 = vadd.f32 %v984_v1, %v1925_v18  ;;  %v986_v63 = vpop.f32.mrb[29].mxu0  ;;  %1358 = vmatprep.mubr.bf16.mxu0 %v1637_v2  ;;  %878 = vperm.xlu1 %1591, %v835_v47  }
 0x39c   : > { %v1140_v41 = vmax.f32 %v1124_v62, 0.0  ;;  %v987_v3 = vadd.f32 %v986_v63, %v1925_v18  ;;  %v988_v0 = vpop.f32.mrb[30].mxu0  ;;  %v1171_v62 = vpop.permute.xlu1 %1170 }
 0x39d   : > { %v1149_v21 = vpack.c.bf16 %v1139_v7, %v1137_v6  ;;  %v1061_v31 = vadd.f32 %v1045_v11, %v985_v13  ;;  %v989_v61 = vadd.f32 %v988_v0, %v1943_v54  ;;  %v990_v22 = vpop.f32.mrb[31].mxu0 }
 0x39e   : > { %v1062_v23 = vadd.f32 %v1046_v15, %v987_v3  ;;  %v991_v9 = vadd.f32 %v990_v22, %v1943_v54  ;;  %v1150_v25 = vpack.c.bf16 %v1140_v41, %v1138_v14  ;;  %v1607_v54 = vld [vmem:[%s2036_s2 + $0x78] sm:$0xff]  }
 0x39f   : > { %v1125_v26 = vadd.f32 %v1109_v12, %v1061_v31  ;;  %v1063_v27 = vadd.f32 %v1047_v36, %v989_v61  ;;  %v1175_v12 = vpop.permute.xlu0 %1174 }
 0x3a0   : > { %v1126_v18 = vadd.f32 %v1110_v5, %v1062_v23  ;;  %v1064_v16 = vadd.f32 %v1048_v20, %v991_v9  ;;  %1229 = vmatprep.subr.bf16.mxu1 %v1150_v25  ;;  %v1179_v31 = vpop.permute.xlu1 %1178 }
 0x3a1   : > { %v1127_v32 = vadd.f32 %v1111_v24, %v1063_v27  ;;  %1230 = vmatpush1.bf16.msra.mxu1 %v1149_v21  ;;  %v1141_v33 = vmax.f32 %v1125_v26, 0.0 }
 0x3a2   : > { %v1128_v4 = vadd.f32 %v1112_v28, %v1064_v16  ;;  %v1142_v35 = vmax.f32 %v1126_v18, 0.0 }
 0x3a3   : > { %v1143_v34 = vmax.f32 %v1127_v32, 0.0  ;;  %v1183_v9 = vpop.permute.xlu0 %1182 }
 0x3a4   : > { %v1144_v17 = vmax.f32 %v1128_v4, 0.0 }
 0x3a5   : > { %v1151_v37 = vpack.c.bf16 %v1143_v34, %v1141_v33  ;;  %v1187_v34 = vpop.permute.xlu1 %1186 }
 0x3a6   : > { %v1152_v38 = vpack.c.bf16 %v1144_v17, %v1142_v35 }
 0x3a8   : > { %1231 = vmatprep.subr.bf16.mxu1 %v1152_v38 }
 0x3a9   : > { %1232 = vmatpush1.bf16.msra.mxu1 %v1151_v37 }
 0x3ac   : > { %1519 = vmatmul.mubr.msk.bf16.vlgmr.msra.gmra.mrb[28].mxu1 %vm659_vm1, %v1607_v54  ;;  %v1191_v54 = vpop.permute.xlu0 %1190 }
 0x3ad   : > { %1267 = vmatprep.mubr.bf16.mxu1 %v1637_v2 }
 0x3b4   : > { %1520 = vmatmul.mubr.msk.bf16.gmra.mrb[32].mxu1 %vm659_vm1, %v1608_v29 }
 0x3b5   : > { %1277 = vmatprep.mubr.bf16.mxu1 %v1637_v2 }
 0x3bc   : > { %1521 = vmatmul.mubr.msk.bf16.gmra.mrb[36].mxu1 %vm659_vm1, %v1609_v30 }
 0x3bd   : > { %1287 = vmatprep.mubr.bf16.mxu1 %v1637_v2 }
 0x3c4   : > { %1522 = vmatmul.mubr.msk.bf16.gmra.mrb[40].mxu1 %vm659_vm1, %v1610_v39 }
 0x47f   : > { %v1259_v50 = vpop.f32.mrb[28].mxu1 }
 0x480   : > { %v1260_v51 = vadd.f32 %v1259_v50, %v1163_v49  ;;  %v1261_v19 = vpop.f32.mrb[29].mxu1 }
 0x481   : > { %v1262_v53 = vadd.f32 %v1261_v19, %v1163_v49  ;;  %v1263_v10 = vpop.f32.mrb[30].mxu1  ;;  %v624_v19 = vpop.permute.xlu1 %623 }
 0x482   : > { %v1264_v2 = vadd.f32 %v1263_v10, %v1167_v52  ;;  %v1265_v55 = vpop.f32.mrb[31].mxu1  ;;  %v1298_v57 = vmax.f32 %v1260_v51, 0.0  ;;  %v1322_v51 = vld [vmem:[%s2036_s2 + $0x98] sm:$0x3] }
 0x483   : > { %v1266_v56 = vadd.f32 %v1265_v55, %v1167_v52  ;;  %v1299_v59 = vmax.f32 %v1262_v53, 0.0  ;;  %v994_v52 = vpop.f32.mrb[32].mxu0 }
 0x484   : > { %v1300_v58 = vmax.f32 %v1264_v2, 0.0  ;;  %v996_v53 = vpop.f32.mrb[33].mxu0 }
 0x485   : > { %v1301_v60 = vmax.f32 %v1266_v56, 0.0  ;;  %v998_v10 = vpop.f32.mrb[34].mxu0  ;;  %v879_v55 = vpop.permute.xlu1 %878 }
 0x486   : > { %v1314_v36 = vpack.c.bf16 %v1300_v58, %v1298_v57  ;;  %v999_v2 = vpop.f32.mrb[35].mxu0  ;;  %v995_v56 = vadd.f32 %v994_v52, %v879_v55  ;;  %v997_v57 = vadd.f32 %v996_v53, %v879_v55  ;;  %v776_v58 = vadd.f32 %v2000_v40, %v624_v19 }
 0x487   : > { %v1315_v11 = vpack.c.bf16 %v1301_v60, %v1299_v59  ;;  %v1269_v1 = vpop.f32.mrb[32].mxu1  ;;  %v778_v59 = vadd.f32 %v2002_v42, %v624_v19 }
 0x488   : > { %v1270_v6 = vadd.f32 %v1269_v1, %v1171_v62  ;;  %v1271_v7 = vpop.f32.mrb[33].mxu1  ;;  %1377 = vst [vmem:[%s208_s26] sm:$0x7] %v995_v56  ;;  %1378 = vst [vmem:[%s208_s26 + $0x8] sm:$0x7] %v997_v57 }
 0x489   : > { %v1272_v13 = vadd.f32 %v1271_v7, %v1171_v62  ;;  %v1273_v63 = vpop.f32.mrb[34].mxu1  ;;  %1326 = vmatprep.subr.bf16.mxu0 %v1315_v11 }
 0x48a   : > { %v1274_v14 = vadd.f32 %v1273_v63, %v1175_v12  ;;  %v1275_v41 = vpop.f32.mrb[35].mxu1  ;;  %1327 = vmatpush1.bf16.msra.mxu0 %v1314_v36  ;;  %v1302_v3 = vmax.f32 %v1270_v6, 0.0  ;;  %v1373_v36 = vpop.permute.xlu0 %1372 }
 0x48b   : > { %v1276_v15 = vadd.f32 %v1275_v41, %v1175_v12  ;;  %v1303_v8 = vmax.f32 %v1272_v13, 0.0 }
 0x48c   : > { %v1304_v0 = vmax.f32 %v1274_v14, 0.0 }
 0x48d   : > { %v1305_v20 = vmax.f32 %v1276_v15, 0.0 }
 0x48e   : > { %v1316_v21 = vpack.c.bf16 %v1304_v0, %v1302_v3 }
 0x48f   : > { %v1317_v61 = vpack.c.bf16 %v1305_v20, %v1303_v8  ;;  %v1279_v22 = vpop.f32.mrb[36].mxu1 }
 0x490   : > { %v1280_v5 = vadd.f32 %v1279_v22, %v1179_v31  ;;  %v1281_v23 = vpop.f32.mrb[37].mxu1 }
 0x491   : > { %v1282_v25 = vadd.f32 %v1281_v23, %v1179_v31  ;;  %v1283_v26 = vpop.f32.mrb[38].mxu1  ;;  %1328 = vmatprep.subr.bf16.mxu0 %v1317_v61 }
 0x492   : > { %v1284_v27 = vadd.f32 %v1283_v26, %v1183_v9  ;;  %v1285_v24 = vpop.f32.mrb[39].mxu1  ;;  %1329 = vmatpush1.bf16.msra.mxu0 %v1316_v21  ;;  %v1306_v16 = vmax.f32 %v1280_v5, 0.0 }
 0x493   : > { %v1286_v18 = vadd.f32 %v1285_v24, %v1183_v9  ;;  %v1307_v32 = vmax.f32 %v1282_v25, 0.0 }
 0x494   : > { %v1308_v28 = vmax.f32 %v1284_v27, 0.0 }
 0x495   : > { %v1309_v4 = vmax.f32 %v1286_v18, 0.0 }
 0x496   : > { %v1318_v33 = vpack.c.bf16 %v1308_v28, %v1306_v16 }
 0x497   : > { %v1319_v35 = vpack.c.bf16 %v1309_v4, %v1307_v32  ;;  %v1289_v17 = vpop.f32.mrb[40].mxu1 }
 0x498   : > { %v1290_v37 = vadd.f32 %v1289_v17, %v1187_v34  ;;  %v1291_v38 = vpop.f32.mrb[41].mxu1 }
 0x499   : > { %v1292_v29 = vadd.f32 %v1291_v38, %v1187_v34  ;;  %v1293_v30 = vpop.f32.mrb[42].mxu1  ;;  %1330 = vmatprep.subr.bf16.mxu0 %v1319_v35 }
 0x49a   : > { %v1294_v39 = vadd.f32 %v1293_v30, %v1191_v54  ;;  %v1295_v43 = vpop.f32.mrb[43].mxu1  ;;  %1331 = vmatpush1.bf16.msra.mxu0 %v1318_v33  ;;  %v1310_v45 = vmax.f32 %v1290_v37, 0.0 }
 0x49b   : > { %v1296_v44 = vadd.f32 %v1295_v43, %v1191_v54  ;;  %v1311_v47 = vmax.f32 %v1292_v29, 0.0 }
 0x49c   : > { %v1312_v46 = vmax.f32 %v1294_v39, 0.0 }
 0x49d   : > { %v1313_v48 = vmax.f32 %v1296_v44, 0.0 }
 0x49e   : > { %v1320_v49 = vpack.c.bf16 %v1312_v46, %v1310_v45 }
 0x49f   : > { %v1321_v50 = vpack.c.bf16 %v1313_v48, %v1311_v47 }
 0x4a1   : > { %1332 = vmatprep.subr.bf16.mxu0 %v1321_v50 }
 0x4a2   : > { %1333 = vmatpush1.bf16.msra.mxu0 %v1320_v49 }
 0x4a5   : > { %1523 = vmatmul.mubr.msk.bf16.vlgmr.msra.gmra.mrb[36].mxu0 %vm659_vm1, %v1322_v51 }
 0x578   : > { %v1360_v60 = vpop.f32.mrb[36].mxu0 }
 0x579   : > { %v1367_v62 = vadd.f32 %v1360_v60, %v776_v58  ;;  %v1362_v11 = vpop.f32.mrb[37].mxu0 }
 0x57a   : > { %v1368_v1 = vadd.f32 %v1362_v11, %v778_v59  ;;  %v1364_v6 = vpop.f32.mrb[38].mxu0 }
 0x57b   : > { %v1375_v7 = vadd.f32 %v1373_v36, %v1367_v62  ;;  %v1365_v12 = vpop.f32.mrb[39].mxu0 }
 0x57c   : > { %v1376_v13 = vadd.f32 %v1373_v36, %v1368_v1 }
 0x57d   : > { %v1381_v63 = vrot.slane %v1375_v7, 5 }
 0x57e   : > { %v1382_v14 = vrot.slane %v1376_v13, 5 }
 0x57f   : > { %1385 = vst [vmem:[%s208_s26] sm:$0x38] %v1381_v63 }
 0x580   : > { %1386 = vst [vmem:[%s208_s26 + $0x8] sm:$0x38] %v1382_v14 }
 0x581 PF: > { %s13_s14 = sadd.s32 1, %s1634_s14   ;;  %s2038_s12 = smov %s1630_s13 }
 0x582   : > { %p10_p5 = scmp.ge.s32.totalorder %s13_s14, 4   ;;  %s2039_s13 = smov %s2041_s15 }
 0x584   :  { %12 = sbr.rel (!%p10_p5) target bundleno = 2 (0x2), region = 62 }

</bundles_post_ra>
